<compile_context>
chip_gen: v7x
topology: tpu7x:2x2x1
jax: 0.10.0
libtpu: 0.0.40
codegen_flags: <defaults>
</compile_context>

<pallas_src>
import math

import jax
import jax.numpy as jnp
from jax.experimental import pallas as pl
from jax.experimental.pallas import tpu as pltpu


# Sub-table sizes and their row offsets inside the stacked table.
MONTH_SIZE, DAY_SIZE, WEEKDAY_SIZE, HOUR_SIZE = 13, 32, 7, 24
MONTH_OFF = 0
DAY_OFF = MONTH_OFF + MONTH_SIZE
WDAY_OFF = DAY_OFF + DAY_SIZE
HOUR_OFF = WDAY_OFF + WEEKDAY_SIZE
K_TOTAL = HOUR_OFF + HOUR_SIZE            # 76
K_PAD = 128                               # full lane-width contraction dim
LANE = 128


def _round_up(v, m):
    return ((v + m - 1) // m) * m


def _temporal_kernel(mark_ref, tbl_ref, o_ref):
    # mark_ref: (TILE_R, 4) int32, columns already offset-shifted into the
    #           stacked table row space (month|day|weekday|hour).
    # tbl_ref:  (K_PAD, d_pad) float32 stacked table (zero padded).
    # o_ref:    (TILE_R, d_pad)
    tile_r = mark_ref.shape[0]
    k = tbl_ref.shape[0]

    marks = mark_ref[...]                                        # (TILE_R, 4)
    iota = jax.lax.broadcasted_iota(jnp.int32, (tile_r, k), 1)   # (TILE_R, 128)

    # Fused one-hot: 4 ones per row; disjoint offset ranges guarantee no
    # collisions, so a single (R,128) @ (128,d) matmul equals the sum of the
    # four embedding lookups.  (Marks arrive as one tile -> one DMA per step;
    # the static lane slices below are cheap relative to the store path.)
    onehot = ((iota == marks[:, 0:1]) | (iota == marks[:, 1:2])
              | (iota == marks[:, 2:3]) | (iota == marks[:, 3:4])
              ).astype(jnp.float32)

    acc = jnp.dot(onehot, tbl_ref[...],
                  preferred_element_type=jnp.float32,
                  precision=jax.lax.Precision.HIGHEST)
    o_ref[...] = acc.astype(o_ref.dtype)


def _pick_row_tile(n_rows, d_pad, out_bytes, budget_bytes=2 << 20,
                   target_steps=8):
    """Row-tile size: multiple of 8, double-buffer-safe output tile size
    (<= budget_bytes), and >= target_steps grid steps when the problem is big
    enough (even step count preferred so both v7x TensorCores stay balanced)."""
    max_rows = max(8, (budget_bytes // max(1, d_pad * out_bytes)) // 8 * 8)
    want = _round_up(max(1, pl.cdiv(n_rows, target_steps)), 8)
    tile = min(max_rows, want, _round_up(n_rows, 8))
    steps = pl.cdiv(n_rows, tile)
    if steps > 1 and steps % 2 == 1:
        cand = max(8, _round_up(pl.cdiv(n_rows, steps + 1), 8))
        if cand <= max_rows and pl.cdiv(n_rows, cand) % 2 == 0:
            tile = cand
    return tile


def temporal_embedding(x_mark, month_tbl, day_tbl, wday_tbl, hour_tbl,
                       out_dtype=jnp.float32):
    """TemporalEmbedding forward (freq='h').  x_mark: (B, L, >=4) int marks."""
    b, seq_len, c = x_mark.shape
    assert c >= 4, "need at least [month, day, weekday, hour] columns"
    d_model = hour_tbl.shape[-1]
    d_pad = _round_up(d_model, LANE)

    # Stack the four tables once; zero-pad rows to K_PAD and cols to d_pad so
    # the contraction dim is one full lane width and stores are lane-dense.
    stacked = jnp.concatenate(
        [month_tbl, day_tbl, wday_tbl, hour_tbl], axis=0).astype(jnp.float32)
    stacked = jnp.pad(stacked, ((0, K_PAD - K_TOTAL), (0, d_pad - d_model)))

    # Flatten to rows and hoist the per-column offset adds out of the kernel.
    n_rows = b * seq_len
    offsets = jnp.array([MONTH_OFF, DAY_OFF, WDAY_OFF, HOUR_OFF], jnp.int32)
    marks = x_mark[..., :4].astype(jnp.int32).reshape(n_rows, 4) + offsets

    out_bytes = jnp.dtype(out_dtype).itemsize
    tile_r = _pick_row_tile(n_rows, d_pad, out_bytes)
    n_steps = pl.cdiv(n_rows, tile_r)
    r_pad = n_steps * tile_r
    # Padded rows become all-zero marks -> a single valid index (row 0), and
    # their output rows are sliced off below; never out-of-bounds.
    marks = jnp.pad(marks, ((0, r_pad - n_rows), (0, 0)))

    out = pl.pallas_call(
        _temporal_kernel,
        out_shape=jax.ShapeDtypeStruct((r_pad, d_pad), out_dtype),
        grid_spec=pltpu.PrefetchScalarGridSpec(
            num_scalar_prefetch=0,
            grid=(n_steps,),
            in_specs=[
                pl.BlockSpec((tile_r, 4), lambda i: (i, 0)),
                # Constant block index -> Pallas does not re-DMA the table.
                pl.BlockSpec((K_PAD, d_pad), lambda i: (0, 0)),
            ],
            out_specs=pl.BlockSpec((tile_r, d_pad), lambda i: (i, 0)),
        ),
        compiler_params=pltpu.CompilerParams(
            dimension_semantics=("parallel",)),
    )(marks, stacked)

    return out[:n_rows, :d_model].reshape(b, seq_len, d_model)


def fixed_sinusoid_table(c_in, d_model):
    """FixedEmbedding weight: sin/cos interleaved, shape (c_in, d_model)."""
    position = jnp.arange(c_in, dtype=jnp.float32)[:, None]
    div_term = jnp.exp(jnp.arange(0, d_model, 2, dtype=jnp.float32)
                       * (-math.log(10000.0) / d_model))
    w = jnp.zeros((c_in, d_model), jnp.float32)
    w = w.at[:, 0::2].set(jnp.sin(position * div_term))
    w = w.at[:, 1::2].set(jnp.cos(position * div_term))
    return w


def reference(x_mark, month_tbl, day_tbl, wday_tbl, hour_tbl):
    """Pure-JAX reference of TemporalEmbedding.forward (freq='h')."""
    x = x_mark.astype(jnp.int32)
    return (hour_tbl[x[:, :, 3]] + wday_tbl[x[:, :, 2]]
            + day_tbl[x[:, :, 1]] + month_tbl[x[:, :, 0]])


if __name__ == "__main__":
    B, L, d_model = 2, 8, 32

    key = jax.random.PRNGKey(0)
    k0, k1, k2, k3 = jax.random.split(key, 4)
    # mark columns: [month 0..12, day 0..31, weekday 0..6, hour 0..23]
    x_mark = jnp.stack([
        jax.random.randint(k0, (B, L), 0, MONTH_SIZE),
        jax.random.randint(k1, (B, L), 0, DAY_SIZE),
        jax.random.randint(k2, (B, L), 0, WEEKDAY_SIZE),
        jax.random.randint(k3, (B, L), 0, HOUR_SIZE),
    ], axis=-1).astype(jnp.int32)

    month_tbl = fixed_sinusoid_table(MONTH_SIZE, d_model)
    day_tbl = fixed_sinusoid_table(DAY_SIZE, d_model)
    wday_tbl = fixed_sinusoid_table(WEEKDAY_SIZE, d_model)
    hour_tbl = fixed_sinusoid_table(HOUR_SIZE, d_model)

    out = temporal_embedding(x_mark, month_tbl, day_tbl, wday_tbl, hour_tbl)
    out = jax.block_until_ready(out)

    ref = reference(x_mark, month_tbl, day_tbl, wday_tbl, hour_tbl)
    assert out.shape == (B, L, d_model)
    assert jnp.allclose(out, ref, atol=1e-5, rtol=1e-5)

    print("KERNEL_OK")
</pallas_src>

<mosaic_0001>
module attributes {stable_mosaic.version = 11 : i64} {
  func.func @_temporal_kernel(%arg0: i32, %arg1: memref<8x4xi32, #tpu.memory_space<vmem>>, %arg2: memref<128x128xf32, #tpu.memory_space<vmem>>, %arg3: memref<8x128xf32, #tpu.memory_space<vmem>>) attributes {dimension_semantics = [#tpu.dimension_semantics<parallel>], iteration_bounds = array<i64: 2>, scalar_prefetch = 0 : i64, scratch_operands = 0 : i64, tpu.core_type = #tpu.core_type<tc>, window_params = [{transform_indices = @transform_0, window_bounds = array<i64: 8, 4>}, {pipeline_mode = #tpu.pipeline_mode<synchronous>, transform_indices = @transform_1, window_bounds = array<i64: 128, 128>}, {transform_indices = @transform_2, window_bounds = array<i64: 8, 128>}]} {
    %c0 = arith.constant 0 : index
    %c0_0 = arith.constant 0 : index
    %0 = vector.load %arg1[%c0, %c0_0] : memref<8x4xi32, #tpu.memory_space<vmem>>, vector<8x4xi32>
    %1 = tpu.iota {dimensions = array<i32: 1>} : vector<8x128xi32>
    %2 = vector.extract_strided_slice %0 {offsets = [0, 0], sizes = [8, 1], strides = [1, 1]} : vector<8x4xi32> to vector<8x1xi32>
    %3 = vector.broadcast %2 : vector<8x1xi32> to vector<8x128xi32>
    %4 = arith.cmpi eq, %1, %3 : vector<8x128xi32>
    %5 = vector.extract_strided_slice %0 {offsets = [0, 1], sizes = [8, 1], strides = [1, 1]} : vector<8x4xi32> to vector<8x1xi32>
    %6 = vector.broadcast %5 : vector<8x1xi32> to vector<8x128xi32>
    %7 = arith.cmpi eq, %1, %6 : vector<8x128xi32>
    %8 = arith.ori %4, %7 : vector<8x128xi1>
    %9 = vector.extract_strided_slice %0 {offsets = [0, 2], sizes = [8, 1], strides = [1, 1]} : vector<8x4xi32> to vector<8x1xi32>
    %10 = vector.broadcast %9 : vector<8x1xi32> to vector<8x128xi32>
    %11 = arith.cmpi eq, %1, %10 : vector<8x128xi32>
    %12 = arith.ori %8, %11 : vector<8x128xi1>
    %13 = vector.extract_strided_slice %0 {offsets = [0, 3], sizes = [8, 1], strides = [1, 1]} : vector<8x4xi32> to vector<8x1xi32>
    %14 = vector.broadcast %13 : vector<8x1xi32> to vector<8x128xi32>
    %15 = arith.cmpi eq, %1, %14 : vector<8x128xi32>
    %16 = arith.ori %12, %15 : vector<8x128xi1>
    %17 = arith.extui %16 : vector<8x128xi1> to vector<8x128xi32>
    %18 = arith.sitofp %17 : vector<8x128xi32> to vector<8x128xf32>
    %c0_1 = arith.constant 0 : index
    %c0_2 = arith.constant 0 : index
    %19 = vector.load %arg2[%c0_1, %c0_2] : memref<128x128xf32, #tpu.memory_space<vmem>>, vector<128x128xf32>
    %cst = arith.constant dense<0.000000e+00> : vector<8x128xf32>
    %20 = tpu.matmul %18, %19, %cst {dimension_numbers = #tpu.dot_dimension_numbers<[1], [0], [0], [1], [0, 0, 1, 1], [], []>, precision = #tpu.contract_precision<fp32>} : vector<8x128xf32>, vector<128x128xf32>, vector<8x128xf32> -> vector<8x128xf32>
    %c0_3 = arith.constant 0 : index
    %c0_4 = arith.constant 0 : index
    %21 = vector.load %arg3[%c0_3, %c0_4] : memref<8x128xf32, #tpu.memory_space<vmem>>, vector<8x128xf32>
    tpu.vector_store %arg3[%c0_3, %c0_4], %20 {strides = array<i32>} : memref<8x128xf32, #tpu.memory_space<vmem>>, vector<8x128xf32>,
    return
  }
  func.func @transform_0(%arg0: i32) -> (i32, i32) {
    %c0_i32 = arith.constant 0 : i32
    %c0_i32_0 = arith.constant 0 : i32
    return %arg0, %c0_i32 : i32, i32
  }
  func.func @transform_1(%arg0: i32) -> (i32, i32) {
    %c0_i32 = arith.constant 0 : i32
    %c0_i32_0 = arith.constant 0 : i32
    %c0_i32_1 = arith.constant 0 : i32
    return %c0_i32, %c0_i32_0 : i32, i32
  }
  func.func @transform_2(%arg0: i32) -> (i32, i32) {
    %c0_i32 = arith.constant 0 : i32
    %c0_i32_0 = arith.constant 0 : i32
    return %arg0, %c0_i32 : i32, i32
  }
}

</mosaic_0001>

<bundles_post_ra>
// kernel: tpu_custom_call.1
= control target key start
LH: loop header
LB: loop body
LE: loop exit
PB: predicated region body
PF: predicated region fallthrough
CT: control target
= control target key end

     0   :  { %7 = vsyncpa [#allocation3], 0  ;;  %s2049_s0 = inlined_call_operand.vmem [shape: s32[16,4], index: 0, kind: input, shape index: {}]   ;;  %s2050_s1 = inlined_call_operand.hbm [shape: f32[128,128], index: 1, kind: input, shape index: {}]   ;;  %s2051_s2 = inlined_call_operand.hbm [shape: f32[16,128], index: 2, kind: output, shape index: {}]  }
   0x1   :  { %8 = vsyncpa [#allocation4], 0 }
   0x2   :  { %10 = vsyncpa [#allocation4 + $0x1], 0  ;;  %s1590_s9 = smov 0   ;;  %s1592_s10 = smov 0  }
   0x3   :  { %s1594_s11 = smov 0   ;;  %s1596_s12 = smov 0  }
   0x4 LB: > { %s1611_s13 = sadd.s32 4294967295, %s1561_s12   ;;  %s921_s14 = sadd.s32 4294967294, %s1561_s12   ;;  %s1561_s12 = sphi %s1596_s12, %s2069_s12   ;;  %s1557_s11 = sphi %s1594_s11, %s2068_s11   ;;  %s1553_s10 = sphi %s1592_s10, %s2067_s10   ;;  %s1549_s9 = sphi %s1590_s9, %s2066_s9  }
   0x5   : > { %s1615_s15 = sadd.s32 1, %s1561_s12   ;;  %s70_s16 = sadd.s32 1, %s1557_s11 }
   0x6   : > { %s67_s17 = ssub.s32 %s1561_s12, %s1615_s15  ;;  %p80_p0 = scmp.ne.s32.totalorder %s1557_s11, %s1553_s10 }
   0x7   : > { %p68_p1 = scmp.eq.s32.totalorder %s67_s17, 0  ;;  %p81_p2 = scmp.eq.s32.totalorder %s1611_s13, 1 }
   0x8   : > { %p86_p3 = scmp.ne.s32.totalorder %s1553_s10, %s1549_s9  ;;  %p87_p4 = scmp.eq.s32.totalorder %s921_s14, 1 }
   0x9   : > { %s1626_s18 = scalar_select %p68_p1, %s1557_s11, %s70_s16  }
   0xa   : > { %p1628_p5 = por %p81_p2, %p80_p0  ;;  %p1632_p6 = por %p87_p4, %p86_p3 }
   0xb   : > { %p922_p7 = scmp.ge.s32.totalorder %s1561_s12, 1  ;;  %p94_p8 = scmp.lt.s32.totalorder %s1561_s12, 3 }
   0xc   : > { %s2055_s19 = scalar_select %p1628_p5, 1, 0 }
   0xd   : > { %s2056_s20 = scalar_select %p1632_p6, 1, 0 }
   0xe   : > { %p2052_p9 = scmp.eq.s32.totalorder %s1611_s13, 0  ;;  %p1639_p10 = pnand %p922_p7, %p94_p8 }
   0xf   : > { %s1563_s22 = smov [#allocation2]   ;;  %s1467_s27 = scalar_lea.hbm %s2050_s1, 2048 }
  0x10   : > { %s2057_s21 = scalar_select %p1639_p10, 1, 0 }
  0x11   : > { %s106_s23 = sshll.u32 %s1563_s22, 4  ;;  %p1408_p11 = pneg %p1639_p10  ;;  %s107_s23 = int_to_ptr.vmem [resolvable:$true] %s106_s23 }
  0x12   : > { %p1468_p13 = scmp.ne.s32.totalorder %s2050_s1, %s1467_s27  ;;  %p1474_p3 = scmp.lt.u32.totalorder %s1467_s27, %s2050_s1 }
  0x13   : > { %p1647_p12 = pnand %p2052_p9, %p1408_p11 }
  0x15   : > { %p1469_p0 = pneg %p1647_p12 }
  0x17   : > { %p1470_p1 = pnand %p1469_p0, %p1468_p13 }
  0x19   : > { %p1471_p2 = pneg %p1470_p1 }
  0x1b   : > { %p1476_p4 = pnand %p1474_p3, %p1471_p2 }
  0x1d   : > { %1479 = shalt.err (!%p1476_p4)
}
  0x1e   : > { %s1480_s4 = scalar_lea.vmem %s107_s23, 2048  ;;  %p1488_p9 = scmp.lt.s32.totalorder %s107_s23, %s107_s23 }
  0x1f   : > { %p1481_p7 = scmp.ne.s32.totalorder %s107_s23, %s1480_s4  ;;  %p1489_p6 = scmp.lt.s32.totalorder %s1480_s4, %s1480_s4 }
  0x21   : > { %p1483_p8 = pnand %p1481_p7, %p1469_p0  ;;  %p1490_p5 = por %p1489_p6, %p1488_p9 }
  0x23   : > { %p1484_p11 = pneg %p1483_p8 }
  0x25   : > { %p1491_p10 = pnand %p1490_p5, %p1484_p11 }
  0x27   : > { %1494 = shalt.err (!%p1491_p10)
}
  0x28   : > { %s1564_s5 = smov 128   ;;  %s1565_s6 = smov 8  }
  0x29   : > { %1411 = dma.hbm_to_vmem [thread:$0]  (!%p1647_p12), %s2050_s1, 2048, %s107_s23, [#allocation3], %s1564_s5, %s1564_s5, %s1565_s6  }
  0x2a   : > { %p2059_p13 = scmp.ne.s32.totalorder %s2057_s21, 0 }
  0x2b   : > { %p2060_p1 = scmp.eq.s32.totalorder (!%p2059_p13), %s1611_s13, 0 }
  0x2c   : > { %129 = sbr.rel (%p2059_p13) target bundleno = 497 (0x1f1), region = 28 }
  0x33   : > { %1540 = dma.done.wait (%p2060_p1), [#allocation3], 2048   ;;  %p2061_p0 = pmov %p2060_p1 }
  0x34   : > { %p150_p5 = scmp.lt.s32.totalorder %s1611_s13, 1  ;;  %v1566_v0 = vmov 0   ;;  %v1567_v1 = vmov 2   ;;  %v1568_v2 = vmov 0.0|0.0   ;;  %v178_v4 = vld [vmem:[#allocation2] sm:$0xff]  ;;  %v179_v5 = vld [vmem:[#allocation2 + $0x8] sm:$0xff] }
  0x35   : > { %1542 = vsyncadd (%p2061_p0), [#allocation3], 4294965248  ;;  %1462 = vset.pattern.permute.xlu0 %v1566_v0  ;;  %1464 = vset.pattern.permute.xlu1 %v1567_v1  ;;  %v195_v6 = vand.u32 4294901760, %v178_v4  ;;  %v198_v7 = vand.u32 4294901760, %v179_v5  ;;  %v180_v8 = vld [vmem:[#allocation2 + $0x10] sm:$0xff]  ;;  %v181_v9 = vld [vmem:[#allocation2 + $0x18] sm:$0xff] }
  0x36   : > { %s151_s14 = scalar_select %p150_p5, %s1611_s13, 1  ;;  %1321 = vmatprep.subr.bf16.mxu0 %v1568_v2  ;;  %1249 = vmatprep.subr.bf16.mxu1 %v1568_v2  ;;  %v182_v10 = vld [vmem:[#allocation2 + $0x20] sm:$0xff]  ;;  %v201_v11 = vand.u32 4294901760, %v180_v8  ;;  %v204_v12 = vand.u32 4294901760, %v181_v9  ;;  %v183_v13 = vld [vmem:[#allocation2 + $0x28] sm:$0xff]  ;;  %v1680_v15 = vld [vmem:[#allocation2 + $0x30] sm:$0xff] }
  0x37   : > { %v207_v14 = vand.u32 4294901760, %v182_v10  ;;  %v1682_v16 = vld [vmem:[#allocation2 + $0x38] sm:$0xff]  ;;  %v1684_v17 = vpack.c.bf16 %v198_v7, %v195_v6  ;;  %v1686_v18 = vsub.f32 %v178_v4, %v195_v6  ;;  %v1688_v19 = vsub.f32 %v179_v5, %v198_v7  ;;  %v1690_v21 = vld [vmem:[#allocation2 + $0x40] sm:$0xff]  ;;  %v1692_v22 = vld [vmem:[#allocation2 + $0x48] sm:$0xff]  ;;  %s147_s23 = sand.u32 1, %s1553_s10   ;;  %s934_s25 = sshll.u32 %s1611_s13, 7 }
  0x38   : > { %s928_s16 = sshll.u32 %s151_s14, 3  ;;  %v210_v20 = vand.u32 4294901760, %v183_v13  ;;  %v1694_v23 = vld [vmem:[#allocation2 + $0x50] sm:$0xff]  ;;  %v1696_v24 = vsub.f32 %v180_v8, %v201_v11  ;;  %v1698_v25 = vsub.f32 %v181_v9, %v204_v12  ;;  %v1702_v27 = vld [vmem:[#allocation2 + $0x58] sm:$0xff]  ;;  %v1704_v28 = vld [vmem:[#allocation2 + $0x60] sm:$0xff]  ;;  %v1569_v29 = vmov 1   ;;  %s2007_s30 = scalar_lea.hbm %s2051_s2, %s934_s25 }
  0x39   : > { %s153_s22 = scalar_lea.vmem %s2049_s0, %s928_s16  ;;  %v1700_v26 = vsub.f32 %v182_v10, %v207_v14  ;;  %v1570_v30 = vmov 3   ;;  %v213_v32 = vand.u32 4294901760, %v1680_v15  ;;  %v216_v33 = vand.u32 4294901760, %v1682_v16  ;;  %v1710_v34 = vld [vmem:[#allocation2 + $0x68] sm:$0xff]  ;;  %1323 = vmatpush3.bf16.msra.mxu0 %v1684_v17  ;;  %1251 = vmatpush3.bf16.msra.mxu1 %v1684_v17  ;;  %v1727_v43 = vld [vmem:[#allocation2 + $0x70] sm:$0xff]  ;;  %v1738_v47 = vld [vmem:[#allocation2 + $0x78] sm:$0xff] }
  0x3a   : > { %v154_v3 = vld [vmem:[%s153_s22] sm:$0xff]  ;;  %v1706_v31 = vsub.f32 %v183_v13, %v210_v20  ;;  %v1712_v35 = vpack.c.bf16 %v204_v12, %v201_v11  ;;  %v219_v36 = vand.u32 4294901760, %v1690_v21  ;;  %v222_v37 = vand.u32 4294901760, %v1692_v22  ;;  %1324 = vmatprep.subr.bf16.mxu0 %v1568_v2  ;;  %1252 = vmatprep.subr.bf16.mxu1 %v1568_v2  ;;  %s927_s24 = sshll.u32 %s147_s23, 3  ;;  %s837_s3 = scalar_lea.sflag [#allocation4], %s147_s23 }
  0x3b   : > { %158 = vperm.xlu0 %1462, %v154_v3   ;;  %167 = vperm.xlu1 %1464, %v154_v3   ;;  %v225_v38 = vand.u32 4294901760, %v1694_v23  ;;  %v1720_v39 = vsub.f32 %v1680_v15, %v213_v32  ;;  %v1723_v40 = vsub.f32 %v1682_v16, %v216_v33  ;;  %v228_v41 = vand.u32 4294901760, %v1702_v27  ;;  %s149_s26 = scalar_lea.vmem [#allocation5], %s927_s24  ;;  %p2064_p9 = scmp.ne.s32.totalorder %s2055_s19, 0 }
  0x3c   : > { %v231_v42 = vand.u32 4294901760, %v1704_v28  ;;  %v1732_v44 = vsub.f32 %v1690_v21, %v219_v36  ;;  %v1735_v45 = vsub.f32 %v1692_v22, %v222_v37  ;;  %v234_v46 = vand.u32 4294901760, %v1710_v34  ;;  %s850_s27 = sshll.u32 %s149_s26, 4  ;;  %s1574_s13 = smov [#allocation5]   ;;  %s2009_s27 = int_to_ptr.vmem [resolvable:$true] %s850_s27 }
  0x3d   : > { %v1743_v48 = vsub.f32 %v1694_v23, %v225_v38  ;;  %v1746_v49 = vsub.f32 %v1702_v27, %v228_v41  ;;  %v1753_v51 = vpack.c.bf16 %v210_v20, %v207_v14  ;;  %v237_v53 = vand.u32 4294901760, %v1727_v43  ;;  %1326 = vmatpush3.bf16.msra.mxu0 %v1712_v35  ;;  %1254 = vmatpush3.bf16.msra.mxu1 %v1712_v35  ;;  %s1495_s4 = scalar_lea.vmem %s2009_s27, 128  ;;  %s1499_s5 = sshll.u32 %s1574_s13, 4  ;;  %s1500_s5 = int_to_ptr.vmem [resolvable:$false] %s1499_s5 }
  0x3e   : > { %v1751_v50 = vsub.f32 %v1704_v28, %v231_v42  ;;  %v1758_v52 = vsub.f32 %v1710_v34, %v234_v46  ;;  %v240_v54 = vand.u32 4294901760, %v1738_v47  ;;  %v288_v55 = vand.u32 4294901760, %v1686_v18  ;;  %1327 = vmatprep.subr.bf16.mxu0 %v1568_v2  ;;  %1255 = vmatprep.subr.bf16.mxu1 %v1568_v2  ;;  %p1496_p6 = scmp.ne.s32.totalorder %s2009_s27, %s1495_s4  ;;  %s1501_s6 = scalar_lea.vmem %s1500_s5, 256 }
  0x3f   : > { %1463 = vset.pattern.permute.xlu0 %v1569_v29  ;;  %1465 = vset.pattern.permute.xlu1 %v1570_v30  ;;  %v295_v56 = vand.u32 4294901760, %v1688_v19  ;;  %v1771_v57 = vsub.f32 %v1727_v43, %v237_v53  ;;  %vm1571_vm0 = vmmov 0   ;;  %v1572_v59 = vmov 0.0   ;;  %p1502_p2 = scmp.lt.s32.totalorder %s2009_s27, %s1500_s5  ;;  %p1503_p3 = scmp.lt.s32.totalorder %s1501_s6, %s1495_s4 }
  0x40   : > { %162 = vperm.xlu0 %1463, %v154_v3   ;;  %172 = vperm.xlu1 %1465, %v154_v3   ;;  %v1776_v58 = vsub.f32 %v1738_v47, %v240_v54  ;;  %v289_v61 = vsub.f32 %v1686_v18, %v288_v55  ;;  %v1788_v63 = vpack.c.bf16 %v216_v33, %v213_v32  ;;  %v302_v3 = vand.u32 4294901760, %v1696_v24  ;;  %p1497_p10 = pnand %p1496_p6, %p2064_p9 }
  0x41   : > { %1176 = vmatprep.mubr.msk.f32.mxu0 %vm1571_vm0, %v1572_v59  ;;  %v1780_v60 = vpack.c.bf16 %v295_v56, %v288_v55  ;;  %1071 = vmatprep.mubr.msk.f32.mxu1 %vm1571_vm0, %v1572_v59  ;;  %v296_v62 = vsub.f32 %v1688_v19, %v295_v56  ;;  %v309_v4 = vand.u32 4294901760, %v1698_v25  ;;  %v1802_v9 = vpack.c.bf16 %v222_v37, %v219_v36  ;;  %p1504_p4 = por %p1503_p3, %p1502_p2 }
  0x42   : > { %1329 = vmatpush3.bf16.msra.mxu0 %v1753_v51  ;;  %1257 = vmatpush3.bf16.msra.mxu1 %v1753_v51  ;;  %v290_v0 = vand.u32 4294901760, %v289_v61  ;;  %v303_v7 = vsub.f32 %v1696_v24, %v302_v3  ;;  %v316_v12 = vand.u32 4294901760, %v1700_v26  ;;  %v323_v13 = vand.u32 4294901760, %v1706_v31  ;;  %p1498_p12 = pneg %p1497_p10 }
  0x43   : > { %1330 = vmatprep.subr.bf16.mxu0 %v1568_v2  ;;  %1258 = vmatprep.subr.bf16.mxu1 %v1568_v2  ;;  %v297_v1 = vand.u32 4294901760, %v296_v62  ;;  %v1796_v6 = vpack.c.bf16 %v309_v4, %v302_v3  ;;  %v310_v8 = vsub.f32 %v1698_v25, %v309_v4  ;;  %v1818_v21 = vpack.c.bf16 %v228_v41, %v225_v38 }
  0x44   : > { %1466 = vset.pattern.permute.xlu0 %v1570_v30  ;;  %v304_v10 = vand.u32 4294901760, %v303_v7  ;;  %v1810_v15 = vpack.c.bf16 %v323_v13, %v316_v12  ;;  %v317_v16 = vsub.f32 %v1700_v26, %v316_v12  ;;  %v324_v20 = vsub.f32 %v1706_v31, %v323_v13  ;;  %p1505_p7 = pnand %p1504_p4, %p1498_p12 }
  0x45   : > { %v1794_v5 = vpack.c.bf16 %v297_v1, %v290_v0  ;;  %v311_v11 = vand.u32 4294901760, %v310_v8  ;;  %v330_v29 = vand.u32 4294901760, %v1720_v39  ;;  %v337_v30 = vand.u32 4294901760, %v1723_v40 }
  0x46   : > { %1332 = vmatpush3.bf16.msra.mxu0 %v1788_v63  ;;  %1260 = vmatpush3.bf16.msra.mxu1 %v1788_v63  ;;  %v318_v22 = vand.u32 4294901760, %v317_v16  ;;  %v325_v27 = vand.u32 4294901760, %v324_v20  ;;  %v1836_v37 = vpack.c.bf16 %v234_v46, %v231_v42  ;;  %v344_v55 = vand.u32 4294901760, %v1732_v44 }
  0x47   : > { %1333 = vmatprep.subr.bf16.mxu0 %v1568_v2  ;;  %1261 = vmatprep.subr.bf16.mxu1 %v1568_v2  ;;  %v1808_v14 = vpack.c.bf16 %v311_v11, %v304_v10  ;;  %v1826_v33 = vpack.c.bf16 %v337_v30, %v330_v29  ;;  %v331_v36 = vsub.f32 %v1720_v39, %v330_v29  ;;  %v351_v56 = vand.u32 4294901760, %v1735_v45 }
  0x48   : > { %v1824_v32 = vpack.c.bf16 %v325_v27, %v318_v22  ;;  %v338_v23 = vsub.f32 %v1723_v40, %v337_v30  ;;  %v345_v28 = vsub.f32 %v1732_v44, %v344_v55  ;;  %v1854_v42 = vpack.c.bf16 %v240_v54, %v237_v53 }
  0x49   : > { %v332_v38 = vand.u32 4294901760, %v331_v36  ;;  %v1844_v62 = vpack.c.bf16 %v351_v56, %v344_v55  ;;  %v352_v34 = vsub.f32 %v1735_v45, %v351_v56  ;;  %v358_v1 = vand.u32 4294901760, %v1743_v48 }
  0x4a   : > { %1335 = vmatpush3.bf16.msra.mxu0 %v1802_v9  ;;  %1263 = vmatpush3.bf16.msra.mxu1 %v1802_v9  ;;  %v339_v41 = vand.u32 4294901760, %v338_v23  ;;  %v346_v46 = vand.u32 4294901760, %v345_v28  ;;  %v365_v3 = vand.u32 4294901760, %v1746_v49  ;;  %v372_v8 = vand.u32 4294901760, %v1751_v50 }
  0x4b   : > { %1336 = vmatprep.subr.bf16.mxu0 %v1568_v2  ;;  %1264 = vmatprep.subr.bf16.mxu1 %v1568_v2  ;;  %v353_v0 = vand.u32 4294901760, %v352_v34  ;;  %v359_v43 = vsub.f32 %v1743_v48, %v358_v1  ;;  %v379_v10 = vand.u32 4294901760, %v1758_v52  ;;  %v386_v27 = vand.u32 4294901760, %v1771_v57 }
  0x4c   : > { %v1842_v61 = vpack.c.bf16 %v339_v41, %v332_v38  ;;  %v1862_v7 = vpack.c.bf16 %v365_v3, %v358_v1  ;;  %v366_v47 = vsub.f32 %v1746_v49, %v365_v3  ;;  %v373_v13 = vsub.f32 %v1751_v50, %v372_v8 }
  0x4d   : > { %v1860_v4 = vpack.c.bf16 %v353_v0, %v346_v46  ;;  %v360_v53 = vand.u32 4294901760, %v359_v43  ;;  %v1874_v12 = vpack.c.bf16 %v379_v10, %v372_v8  ;;  %v380_v16 = vsub.f32 %v1758_v52, %v379_v10 }
  0x4e   : > { %1338 = vmatpush3.bf16.msra.mxu0 %v1818_v21  ;;  %1266 = vmatpush3.bf16.msra.mxu1 %v1818_v21  ;;  %v367_v54 = vand.u32 4294901760, %v366_v47  ;;  %v374_v20 = vand.u32 4294901760, %v373_v13  ;;  %v393_v29 = vand.u32 4294901760, %v1776_v58  ;;  %v387_v23 = vsub.f32 %v1771_v57, %v386_v27 }
  0x4f   : > { %1339 = vmatprep.subr.bf16.mxu0 %v1568_v2  ;;  %1267 = vmatprep.subr.bf16.mxu1 %v1568_v2  ;;  %v381_v22 = vand.u32 4294901760, %v380_v16  ;;  %v1298_v28 = vpack.c.bf16 %v1688_v19, %v1686_v18  ;;  %v1301_v34 = vpack.c.bf16 %v1698_v25, %v1696_v24  ;;  %v1304_v46 = vpack.c.bf16 %v1706_v31, %v1700_v26 }
  0x50   : > { %v1872_v11 = vpack.c.bf16 %v367_v54, %v360_v53  ;;  %v1367_v36 = vpack.c.bf16 %v393_v29, %v386_v27  ;;  %v394_v38 = vsub.f32 %v1776_v58, %v393_v29  ;;  %v388_v41 = vand.u32 4294901760, %v387_v23 }
  0x51   : > { %v1292_v30 = vpack.c.bf16 %v381_v22, %v374_v20  ;;  %v1307_v0 = vpack.c.bf16 %v1723_v40, %v1720_v39  ;;  %v1310_v1 = vpack.c.bf16 %v1735_v45, %v1732_v44  ;;  %v1313_v3 = vpack.c.bf16 %v1746_v49, %v1743_v48 }
  0x52   : > { %1341 = vmatpush3.bf16.msra.mxu0 %v1836_v37  ;;  %1269 = vmatpush3.bf16.msra.mxu1 %v1836_v37  ;;  %v395_v55 = vand.u32 4294901760, %v394_v38  ;;  %v1316_v43 = vpack.c.bf16 %v1758_v52, %v1751_v50  ;;  %v1319_v47 = vpack.c.bf16 %v1776_v58, %v1771_v57  ;;  %v155_v53 = vlaneseq }
  0x53   : > { %1342 = vmatprep.subr.bf16.mxu0 %v1568_v2  ;;  %1270 = vmatprep.subr.bf16.mxu1 %v1568_v2 }
  0x54   : > { %v1882_v56 = vpack.c.bf16 %v395_v55, %v388_v41  ;;  %v156_v10 = vand.u32 127, %v155_v53 }
  0x56   : > { %1344 = vmatpush3.bf16.msra.mxu0 %v1854_v42  ;;  %1272 = vmatpush3.bf16.msra.mxu1 %v1854_v42 }
  0x57   : > { %1345 = vmatprep.subr.bf16.mxu0 %v1568_v2  ;;  %1273 = vmatprep.subr.bf16.mxu1 %v1568_v2 }
  0xba   : > { %v159_v54 = vpop.permute.xlu0 %158  ;;  %v168_v8 = vpop.permute.xlu1 %167 }
  0xbb   : > { %vm160_vm1 = vcmp.eq.s32.totalorder %v156_v10, %v159_v54  ;;  %vm169_vm4 = vcmp.eq.s32.totalorder %v156_v10, %v168_v8 }
  0xbf   : > { %v163_v13 = vpop.permute.xlu0 %162  ;;  %v173_v16 = vpop.permute.xlu1 %172 }
  0xc0   : > { %vm164_vm2 = vcmp.eq.s32.totalorder %v156_v10, %v163_v13  ;;  %vm174_vm3 = vcmp.eq.s32.totalorder %v156_v10, %v173_v16 }
  0xc1   : > { %vm165_vm5 = vmor %vm160_vm1, %vm164_vm2 }
  0xc2   : > { %vm170_vm6 = vmor %vm165_vm5, %vm169_vm4 }
  0xc3   : > { %vm1900_vm7 = vmor %vm170_vm6, %vm174_vm3 }
  0xc4   : > { %v929_v22 = vsel %vm1900_vm7, 1.0, %v1572_v59 }
  0xc5   : > { %v1907_v27 = vsub.f32 %v929_v22, %v929_v22 }
  0xc7   : > { %v277_v29 = vand.u32 4294901760, %v1907_v27 }
  0xc9   : > { %1177 = vmatmul.mubr.f32.vlgmr.msra.gmra.mrb[0].mxu0 %v277_v29  ;;  %v278_v23 = vsub.f32 %v1907_v27, %v277_v29 }
  0xca   : > { %1347 = vmatpush3.bf16.msra.mxu0 %v1780_v60  ;;  %1211 = vmatprep.mubr.msk.f32.mxu0 %vm1571_vm0, %v1572_v59  ;;  %v1573_v60 = vmov 1.0  }
  0xcb   : > { %1348 = vmatprep.subr.bf16.mxu0 %v1568_v2  ;;  %v279_v38 = vand.u32 4294901760, %v278_v23 }
  0xcd   : > { %1072 = vmatmul.mubr.f32.vlgmr.msra.gmra.mrb[0].mxu1 %v279_v38 }
  0xce   : > { %1275 = vmatpush3.bf16.msra.mxu1 %v1794_v5  ;;  %1350 = vmatpush3.bf16.msra.mxu0 %v1796_v6 }
  0xcf   : > { %1276 = vmatprep.subr.bf16.mxu1 %v1568_v2  ;;  %1351 = vmatprep.subr.bf16.mxu0 %v1568_v2 }
  0xd0   : > { %1106 = vmatprep.mubr.msk.f32.mxu1 %vm1571_vm0, %v1572_v59 }
  0xd2   : > { %1278 = vmatpush3.bf16.msra.mxu1 %v1808_v14  ;;  %1353 = vmatpush3.bf16.msra.mxu0 %v1810_v15 }
  0xd3   : > { %1279 = vmatprep.subr.bf16.mxu1 %v1568_v2  ;;  %1354 = vmatprep.subr.bf16.mxu0 %v1568_v2 }
  0xd6   : > { %1281 = vmatpush3.bf16.msra.mxu1 %v1824_v32  ;;  %1356 = vmatpush3.bf16.msra.mxu0 %v1826_v33 }
  0xd7   : > { %1282 = vmatprep.subr.bf16.mxu1 %v1568_v2  ;;  %1357 = vmatprep.subr.bf16.mxu0 %v1568_v2 }
  0xda   : > { %1284 = vmatpush3.bf16.msra.mxu1 %v1842_v61  ;;  %1359 = vmatpush3.bf16.msra.mxu0 %v1844_v62 }
  0xdb   : > { %1285 = vmatprep.subr.bf16.mxu1 %v1568_v2  ;;  %1360 = vmatprep.subr.bf16.mxu0 %v1568_v2 }
  0xde   : > { %1287 = vmatpush3.bf16.msra.mxu1 %v1860_v4  ;;  %1362 = vmatpush3.bf16.msra.mxu0 %v1862_v7 }
  0xdf   : > { %1288 = vmatprep.subr.bf16.mxu1 %v1568_v2  ;;  %1363 = vmatprep.subr.bf16.mxu0 %v1568_v2 }
  0xe2   : > { %1290 = vmatpush3.bf16.msra.mxu1 %v1872_v11  ;;  %1365 = vmatpush3.bf16.msra.mxu0 %v1874_v12 }
  0xe3   : > { %1291 = vmatprep.subr.bf16.mxu1 %v1568_v2  ;;  %1366 = vmatprep.subr.bf16.mxu0 %v1568_v2 }
  0xe6   : > { %1293 = vmatpush3.bf16.msra.mxu1 %v1292_v30  ;;  %1368 = vmatpush3.bf16.msra.mxu0 %v1367_v36 }
  0xe7   : > { %1294 = vmatprep.subr.bf16.mxu1 %v1568_v2  ;;  %1369 = vmatprep.subr.bf16.mxu0 %v1568_v2 }
  0xe9   : > { %1212 = vmatmul.mubr.msk.f32.vlgmr.msra.gmra.mrb[0].mxu0 %vm1900_vm7, %v1573_v60 }
  0xea   : > { %1296 = vmatpush3.bf16.msra.mxu1 %v1882_v56  ;;  %1371 = vmatpush3.bf16.msra.mxu0 %v1684_v17 }
  0xeb   : > { %1297 = vmatprep.subr.bf16.mxu1 %v1568_v2  ;;  %1372 = vmatprep.subr.bf16.mxu0 %v1568_v2 }
  0xec   : > { %1246 = vmatprep.mubr.msk.f32.mxu0 %vm1571_vm0, %v1572_v59 }
  0xed   : > { %1107 = vmatmul.mubr.msk.f32.vlgmr.msra.gmra.mrb[0].mxu1 %vm1900_vm7, %v1573_v60 }
  0xee   : > { %1299 = vmatpush3.bf16.msra.mxu1 %v1298_v28  ;;  %1374 = vmatpush3.bf16.msra.mxu0 %v1712_v35 }
  0xef   : > { %1300 = vmatprep.subr.bf16.mxu1 %v1568_v2  ;;  %1375 = vmatprep.subr.bf16.mxu0 %v1568_v2 }
  0xf0   : > { %1141 = vmatprep.mubr.msk.f32.mxu1 %vm1571_vm0, %v1572_v59 }
  0xf2   : > { %1302 = vmatpush3.bf16.msra.mxu1 %v1301_v34  ;;  %1377 = vmatpush3.bf16.msra.mxu0 %v1753_v51 }
  0xf3   : > { %1303 = vmatprep.subr.bf16.mxu1 %v1568_v2  ;;  %1378 = vmatprep.subr.bf16.mxu0 %v1568_v2 }
  0xf6   : > { %1305 = vmatpush3.bf16.msra.mxu1 %v1304_v46  ;;  %1380 = vmatpush3.bf16.msra.mxu0 %v1788_v63 }
  0xf7   : > { %1306 = vmatprep.subr.bf16.mxu1 %v1568_v2  ;;  %1381 = vmatprep.subr.bf16.mxu0 %v1568_v2 }
  0xfa   : > { %1308 = vmatpush3.bf16.msra.mxu1 %v1307_v0  ;;  %1383 = vmatpush3.bf16.msra.mxu0 %v1802_v9 }
  0xfb   : > { %1309 = vmatprep.subr.bf16.mxu1 %v1568_v2  ;;  %1384 = vmatprep.subr.bf16.mxu0 %v1568_v2 }
  0xfe   : > { %1311 = vmatpush3.bf16.msra.mxu1 %v1310_v1  ;;  %1386 = vmatpush3.bf16.msra.mxu0 %v1818_v21 }
  0xff   : > { %1312 = vmatprep.subr.bf16.mxu1 %v1568_v2  ;;  %1387 = vmatprep.subr.bf16.mxu0 %v1568_v2 }
 0x102   : > { %1314 = vmatpush3.bf16.msra.mxu1 %v1313_v3  ;;  %1389 = vmatpush3.bf16.msra.mxu0 %v1836_v37 }
 0x103   : > { %1315 = vmatprep.subr.bf16.mxu1 %v1568_v2  ;;  %1390 = vmatprep.subr.bf16.mxu0 %v1568_v2 }
 0x106   : > { %1317 = vmatpush3.bf16.msra.mxu1 %v1316_v43  ;;  %1392 = vmatpush3.bf16.msra.mxu0 %v1854_v42 }
 0x107   : > { %1318 = vmatprep.subr.bf16.mxu1 %v1568_v2 }
 0x109   : > { %1247 = vmatmul.mubr.msk.f32.vlgmr.msra.gmra.mrb[0].mxu0 %vm1900_vm7, %v1573_v60 }
 0x10a   : > { %1320 = vmatpush3.bf16.msra.mxu1 %v1319_v47 }
 0x10d   : > { %1142 = vmatmul.mubr.f32.vlgmr.msra.gmra.mrb[0].mxu1 %v1907_v27 }
 0x1dc   : > { %v831_v17 = vpop.f32.mrb[0].mxu0 }
 0x1dd   : > { %v1248_v18 = vpop.f32.mrb[1].mxu0 }
 0x1e0   : > { %v536_v19 = vpop.f32.mrb[0].mxu1 }
 0x1e1   : > { %v1393_v24 = vadd.f32 %v831_v17, %v536_v19  ;;  %v1143_v2 = vpop.f32.mrb[1].mxu1 }
 0x1e3   : > { %835 = vst [vmem:[%s149_s26] sm:$0xff] %v1393_v24 }
 0x1e4   : > { %1508 = shalt.err (!%p1505_p7)
}
 0x1e5   : > { %s1509_s7 = scalar_lea.hbm %s2007_s30, 128  ;;  %s1513_s16 = scalar_lea.hbm %s2051_s2, 256 }
 0x1e6   : > { %p1510_p8 = scmp.ne.s32.totalorder %s2007_s30, %s1509_s7  ;;  %p1514_p1 = scmp.lt.u32.totalorder %s2007_s30, %s2051_s2 }
 0x1e7   : > { %p1515_p0 = scmp.lt.u32.totalorder %s1513_s16, %s1509_s7  ;;  %p1517_p6 = scmp.lt.u32.totalorder %s1509_s7, %s2007_s30 }
 0x1e8   : > { %p1511_p11 = pnand %p1510_p8, %p2064_p9 }
 0x1e9   : > { %p1516_p5 = por %p1515_p0, %p1514_p1 }
 0x1ea   : > { %p1512_p13 = pneg %p1511_p11 }
 0x1eb   : > { %p1518_p10 = por %p1517_p6, %p1516_p5 }
 0x1ed   : > { %p1519_p12 = pnand %p1518_p10, %p1512_p13 }
 0x1ef   : > { %1522 = shalt.err (!%p1519_p12)
}
 0x1f0   : > { %1406 = dma.vmem_to_hbm [thread:$0]  (%p2064_p9), %s2009_s27, 128, %s2007_s30, %s837_s3  }
 0x1f1 PF: > { %p1418_p2 = scmp.ge.s32.totalorder %s1561_s12, 2  ;;  %s862_s22 = sand.u32 1, %s1549_s9  }
 0x1f2   : > { %p2065_p3 = scmp.ne.s32.totalorder %s2056_s20, 0  ;;  %s863_s23 = scalar_lea.sflag [#allocation4], %s862_s22 }
 0x1f4   : > { %p1413_p4 = pnand %p1418_p2, %p2065_p3 }
 0x1f6   : > { %1544 = dma.done.wait (!%p1413_p4), %s863_s23, 128  }
 0x1f7   : > { %1546 = vsyncadd (!%p1413_p4), %s863_s23, 4294967168  ;;  %p13_p7 = scmp.ge.s32.totalorder %s1615_s15, 4   ;;  %s2066_s9 = smov %s1553_s10 }
 0x1f8   : > { %s2067_s10 = smov %s1557_s11  ;;  %s2068_s11 = smov %s1626_s18 }
 0x1f9   : > { %s2069_s12 = smov %s1615_s15  ;;  %15 = sbr.rel (!%p13_p7) target bundleno = 4 (0x4), region = 68 }
 0x200   :  { %868 = vsyncpa [#allocation3], 1 }
 0x201   :  { %870 = vsyncpa [#allocation3 + $0x1], 1 }
 0x202   :  { %871 = vsyncpa [#allocation4], 1 }
 0x203   :  { %873 = vsyncpa [#allocation4 + $0x1], 1 }

</bundles_post_ra>
